<compile_context>
chip_gen: v7x
topology: tpu7x:2x2x1
jax: 0.10.0
libtpu: 0.0.40
codegen_flags: <defaults>
</compile_context>

<pallas_src>
import jax
import jax.numpy as jnp
from jax.experimental import pallas as pl
from jax.experimental.pallas import tpu as pltpu

MAP_METHOD = "max"       # map_builder reduction over the dense axis ('max' | 'mean' | 'sum')
USE_BF16_INPUTS = True   # cast matmul inputs to bf16 (halves the dominant HBM stream)


def _pick_tile(size: int, limit: int) -> int:
    """Largest power-of-two-ish tile <= limit that evenly divides size, else size."""
    if size <= limit:
        return size
    t = limit
    while t >= 128:
        if size % t == 0:
            return t
        t //= 2
    # TODO(synk): sizes with no multiple-of-128 divisor fall back to an untiled axis;
    # at very large V that would need padding + vmem_limit_bytes tuning.
    return size


# ---------------------------------------------------------------------------
# Kernel 1: map_builder
#   M[b, d, v] = sum_l dense[b, l, d] * sparse[b, l, v], then reduce over d.
#   Grid: (rows, V tiles, D tiles); the output block is resident across the D
#   axis and holds a running max (or sum) so the live intermediate is (TD, TV).
# ---------------------------------------------------------------------------
def map_builder(dense, sparse):
    """dense: (R, L, D), sparse: (R, L, V) -> raw map (R, V) float32."""
    R, L, D = dense.shape
    _, _, V = sparse.shape
    # Conservative tiles: 2*(1,TD,L)+2*(1,L,TV) bf16 blocks + (TD,TV) f32 slab stays
    # well under the 32 MiB scoped-VMEM default on all of v5e/v6e/v7x.
    TV = _pick_tile(V, 2048)   # vocab (lane) tile
    TD = _pick_tile(D, 512)    # dense-dim (sublane) tile

    in_dtype = jnp.bfloat16 if USE_BF16_INPUTS else dense.dtype
    # Pre-transpose dense to (R, D, L) in the wrapper (one-time XLA layout plumbing)
    # so the kernel runs a plain (TD,L)x(L,TV) MXU matmul with no in-kernel transpose.
    dense_t = jnp.transpose(dense, (0, 2, 1)).astype(in_dtype)
    sparse_c = sparse.astype(in_dtype)

    def kernel(dense_ref, sparse_ref, out_ref):
        # dense_ref: (1, TD, L), sparse_ref: (1, L, TV), out_ref: (1, 1, TV) f32
        d_idx = pl.program_id(2)

        @pl.when(d_idx == 0)
        def _init():
            init = -jnp.inf if MAP_METHOD == "max" else 0.0
            out_ref[...] = jnp.full(out_ref.shape, init, dtype=out_ref.dtype)

        m = jax.lax.dot_general(
            dense_ref[0], sparse_ref[0],
            dimension_numbers=(((1,), (0,)), ((), ())),
            preferred_element_type=jnp.float32,
        )  # (TD, TV) f32

        if MAP_METHOD == "max":
            out_ref[...] = jnp.maximum(out_ref[...],
                                       jnp.max(m, axis=0)[None, None, :])
        elif MAP_METHOD in ("mean", "sum"):
            out_ref[...] = out_ref[...] + jnp.sum(m, axis=0)[None, None, :]
        else:
            raise NotImplementedError(MAP_METHOD)

        if MAP_METHOD == "mean":
            @pl.when(d_idx == pl.num_programs(2) - 1)
            def _finalize():
                out_ref[...] = out_ref[...] * (1.0 / D)

    out = pl.pallas_call(
        kernel,
        out_shape=jax.ShapeDtypeStruct((R, 1, V), jnp.float32),
        grid=(R, V // TV, D // TD),
        in_specs=[
            pl.BlockSpec((1, TD, L), lambda b, v, d: (b, d, 0)),
            pl.BlockSpec((1, L, TV), lambda b, v, d: (b, 0, v)),
        ],
        out_specs=pl.BlockSpec((1, 1, TV), lambda b, v, d: (b, 0, v)),
        compiler_params=pltpu.CompilerParams(
            dimension_semantics=("parallel", "parallel", "arbitrary")),
    )(dense_t, sparse_c)
    return out[:, 0, :]  # (R, V)


# ---------------------------------------------------------------------------
# Kernel 2: fused softmax normalizations + KL divergence (sum over all rows).
#   pred   = softmax(raw_map)                          ("Both": norm applied to the map)
#   target = softmax(idf) [hoisted] * softmax(teacher_embeddings)
#   KL row = sum_v softmax(target) * (log_softmax(target) - log_softmax(pred))
# Caller divides the returned sum by the original per-call batch B (batchmean),
# which for the concatenated pos+neg rows equals pos_loss + neg_loss.
# ---------------------------------------------------------------------------
def _kl_map_loss_kernel(map_ref, idf_sm_ref, teacher_ref, out_ref):
    # map_ref: (R, V), idf_sm_ref: (1, V) (already softmaxed), teacher_ref: (R, V)
    raw = map_ref[...].astype(jnp.float32)

    # pred = softmax(raw_map)
    m1 = jnp.max(raw, axis=-1, keepdims=True)
    e1 = jnp.exp(raw - m1)
    pred = e1 * pl.reciprocal(jnp.sum(e1, axis=-1, keepdims=True), approx=True)

    # log_q = log_softmax(pred)  (directly from max/logsumexp of pred)
    m2 = jnp.max(pred, axis=-1, keepdims=True)
    s2 = pred - m2
    log_q = s2 - jnp.log(jnp.sum(jnp.exp(s2), axis=-1, keepdims=True))

    # target = softmax(idf) * softmax(teacher_embeddings)
    t = teacher_ref[...].astype(jnp.float32)
    m3 = jnp.max(t, axis=-1, keepdims=True)
    e3 = jnp.exp(t - m3)
    t_sm = e3 * pl.reciprocal(jnp.sum(e3, axis=-1, keepdims=True), approx=True)
    target = idf_sm_ref[...] * t_sm

    # p = softmax(target); log_p from the same shifted logits (no full-width log
    # pass, and p underflowing to 0 contributes 0 instead of 0*(-inf)=NaN).
    m4 = jnp.max(target, axis=-1, keepdims=True)
    s4 = target - m4
    e4 = jnp.exp(s4)
    z4 = jnp.sum(e4, axis=-1, keepdims=True)
    p = e4 * pl.reciprocal(z4, approx=True)
    log_p = s4 - jnp.log(z4)

    out_ref[0, 0] = jnp.sum(p * (log_p - log_q))


def kl_map_loss_sum(raw_map, idf_softmax, teacher_emb):
    # TODO(synk): for multi-core v7x one could grid this over rows / V chunks with
    # SMEM partial sums; at these sizes a single launch is launch-overhead optimal.
    out = pl.pallas_call(
        _kl_map_loss_kernel,
        out_shape=jax.ShapeDtypeStruct((1, 1), jnp.float32),
        in_specs=[
            pl.BlockSpec(memory_space=pltpu.MemorySpace.VMEM),
            pl.BlockSpec(memory_space=pltpu.MemorySpace.VMEM),
            pl.BlockSpec(memory_space=pltpu.MemorySpace.VMEM),
        ],
        out_specs=pl.BlockSpec(memory_space=pltpu.MemorySpace.SMEM),
    )(raw_map, idf_softmax.reshape(1, -1), teacher_emb)
    return out[0, 0]


# ---------------------------------------------------------------------------
# Full forward pass (equivalent of Dense2SparseMapSemanticIDFNormBothCriterion)
# ---------------------------------------------------------------------------
def criterion_forward(
    pos_encoded_matrix,      # pos_pas_emb['encoded_matrix']             (B, L, D)
    neg_encoded_matrix,      # neg_pas_emb['encoded_matrix']             (B, L, D)
    teacher_pos_logits,      # teacher_pos_pas_emb['encoded_logits']     (B, L, V)
    teacher_neg_logits,      # teacher_neg_pas_emb['encoded_logits']     (B, L, V)
    teacher_pos_embeddings,  # teacher_pos_pas_emb['encoded_embeddings'] (B, V)
    teacher_neg_embeddings,  # teacher_neg_pas_emb['encoded_embeddings'] (B, V)
    pred_pos,                # pos_score_res['relevance']                (B,)
    pred_neg,                # neg_score_res['relevance']                (B,)
    label_margin,            # label margin (teacher pos - neg)          (B,)
    idf,                     # synthetic idf vector                      (V,)
):
    # TODO(synk): MarginMSELoss / KLDivergenceLoss sources were not provided; the
    # standard SPLADE-style definitions are used (MSE on score margins, scale=1;
    # KLDivLoss(reduction='batchmean') on (log_softmax(input), softmax(target))).
    B = pos_encoded_matrix.shape[0]
    margin_mse_loss = jnp.mean((pred_pos - pred_neg - label_margin) ** 2)

    # Fuse pos/neg: one map_builder launch over 2B rows, one KL launch.
    dense_all = jnp.concatenate([pos_encoded_matrix, neg_encoded_matrix], axis=0)
    logits_all = jnp.concatenate([teacher_pos_logits, teacher_neg_logits], axis=0)
    teacher_all = jnp.concatenate(
        [teacher_pos_embeddings, teacher_neg_embeddings], axis=0)

    raw_map_all = map_builder(dense_all, logits_all)  # (2B, V) f32

    # Hoisted: softmax(idf) is batch- and pos/neg-independent.
    idf_softmax = jax.nn.softmax(idf.astype(jnp.float32))

    kl_total = kl_map_loss_sum(raw_map_all, idf_softmax, teacher_all)
    map_loss = kl_total / B   # = pos batchmean + neg batchmean

    return {
        "student_loss": margin_mse_loss,
        "map_loss": map_loss,
        "loss": margin_mse_loss + map_loss,
    }


# ---------------------------------------------------------------------------
# Pure-JAX references (mirror the PyTorch semantics) for sanity checks
# ---------------------------------------------------------------------------
def _reference_forward(pm, nm, tpl, tnl, tpe, tne, pp, pn, lm, idf,
                       mirror_bf16=True):
    def ref_map(dense, sparse):
        if mirror_bf16 and USE_BF16_INPUTS:
            dense = dense.astype(jnp.bfloat16).astype(jnp.float32)
            sparse = sparse.astype(jnp.bfloat16).astype(jnp.float32)
        m = jnp.einsum("bld,blv->bdv", dense, sparse,
                       precision=jax.lax.Precision.HIGHEST)
        return jnp.max(m, axis=1)

    def ref_kl(raw_map, idf_v, teacher):
        pred = jax.nn.softmax(raw_map, axis=-1)
        log_q = jax.nn.log_softmax(pred, axis=-1)
        target = jax.nn.softmax(idf_v) * jax.nn.softmax(teacher, axis=-1)
        log_p = jax.nn.log_softmax(target, axis=-1)
        p = jnp.exp(log_p)
        return jnp.sum(p * (log_p - log_q)) / raw_map.shape[0]

    mmse = jnp.mean((pp - pn - lm) ** 2)
    map_loss = ref_kl(ref_map(pm, tpl), idf, tpe) + ref_kl(ref_map(nm, tnl), idf, tne)
    return {"student_loss": mmse, "map_loss": map_loss, "loss": mmse + map_loss}


if __name__ == "__main__":
    B, L, D, V = 2, 8, 128, 128

    key = jax.random.PRNGKey(0)
    ks = jax.random.split(key, 10)
    pos_encoded_matrix = jax.random.normal(ks[0], (B, L, D), jnp.float32)
    neg_encoded_matrix = jax.random.normal(ks[1], (B, L, D), jnp.float32)
    teacher_pos_logits = jax.random.normal(ks[2], (B, L, V), jnp.float32)
    teacher_neg_logits = jax.random.normal(ks[3], (B, L, V), jnp.float32)
    teacher_pos_embeddings = jax.random.normal(ks[4], (B, V), jnp.float32)
    teacher_neg_embeddings = jax.random.normal(ks[5], (B, V), jnp.float32)
    pred_pos = jax.random.normal(ks[6], (B,), jnp.float32)
    pred_neg = jax.random.normal(ks[7], (B,), jnp.float32)
    label_margin = jax.random.normal(ks[8], (B,), jnp.float32)
    # Deterministic synthetic IDF "parameter" (normally loaded from idf_path JSON).
    idf = jnp.abs(jax.random.normal(ks[9], (V,), jnp.float32)) * 5.0

    args = (
        pos_encoded_matrix, neg_encoded_matrix,
        teacher_pos_logits, teacher_neg_logits,
        teacher_pos_embeddings, teacher_neg_embeddings,
        pred_pos, pred_neg, label_margin, idf,
    )

    losses = jax.jit(criterion_forward)(*args)
    jax.block_until_ready(losses["loss"])

    # Tight check vs a reference that mirrors the kernel's bf16 input rounding.
    ref = _reference_forward(*args, mirror_bf16=True)
    for k in ("student_loss", "map_loss", "loss"):
        assert jnp.allclose(losses[k], ref[k], rtol=2e-3, atol=2e-3), (
            k, losses[k], ref[k])

    # Loose check vs full-f32 semantics (bf16 inputs are an approved approximation).
    ref_f32 = _reference_forward(*args, mirror_bf16=False)
    for k in ("student_loss", "map_loss", "loss"):
        assert jnp.allclose(losses[k], ref_f32[k], rtol=5e-2, atol=5e-2), (
            k, losses[k], ref_f32[k])

    print("KERNEL_OK")
</pallas_src>

<mosaic_0001>
module attributes {stable_mosaic.version = 11 : i64} {
  func.func @kernel(%arg0: i32, %arg1: i32, %arg2: i32, %arg3: memref<1x128x8xbf16, #tpu.memory_space<vmem>>, %arg4: memref<1x8x128xbf16, #tpu.memory_space<vmem>>, %arg5: memref<1x1x128xf32, #tpu.memory_space<vmem>>) attributes {dimension_semantics = [#tpu.dimension_semantics<parallel>, #tpu.dimension_semantics<parallel>, #tpu.dimension_semantics<arbitrary>], iteration_bounds = array<i64: 4, 1, 1>, scalar_prefetch = 0 : i64, scratch_operands = 0 : i64, tpu.core_type = #tpu.core_type<tc>, window_params = [{transform_indices = @transform_0, window_bounds = array<i64: 1, 128, 8>}, {transform_indices = @transform_1, window_bounds = array<i64: 1, 8, 128>}, {transform_indices = @transform_2, window_bounds = array<i64: 1, 1, 128>}]} {
    %c0_i32 = arith.constant 0 : i32
    %0 = arith.cmpi eq, %arg2, %c0_i32 : i32
    %1 = arith.extui %0 : i1 to i32
    %c0_i32_0 = arith.constant 0 : i32
    %2 = arith.cmpi ne, %1, %c0_i32_0 : i32
    scf.if %2 {
      %cst_13 = arith.constant 0xFF800000 : f32
      %13 = vector.broadcast %cst_13 : f32 to vector<1x1x128xf32>
      %c0_14 = arith.constant 0 : index
      %c0_15 = arith.constant 0 : index
      %c0_16 = arith.constant 0 : index
      %14 = vector.load %arg5[%c0_14, %c0_15, %c0_16] : memref<1x1x128xf32, #tpu.memory_space<vmem>>, vector<1x1x128xf32>
      tpu.vector_store %arg5[%c0_14, %c0_15, %c0_16], %13 {strides = array<i32>} : memref<1x1x128xf32, #tpu.memory_space<vmem>>, vector<1x1x128xf32>,
    } else {
    }
    %c0 = arith.constant 0 : index
    %c0_1 = arith.constant 0 : index
    %c0_2 = arith.constant 0 : index
    %3 = vector.load %arg3[%c0, %c0_1, %c0_2] : memref<1x128x8xbf16, #tpu.memory_space<vmem>>, vector<1x128x8xbf16>
    %4 = vector.shape_cast %3 : vector<1x128x8xbf16> to vector<128x8xbf16>
    %c0_3 = arith.constant 0 : index
    %c0_4 = arith.constant 0 : index
    %c0_5 = arith.constant 0 : index
    %5 = vector.load %arg4[%c0_3, %c0_4, %c0_5] : memref<1x8x128xbf16, #tpu.memory_space<vmem>>, vector<1x8x128xbf16>
    %6 = vector.shape_cast %5 : vector<1x8x128xbf16> to vector<8x128xbf16>
    %cst = arith.constant dense<0.000000e+00> : vector<128x128xf32>
    %7 = tpu.matmul %4, %6, %cst {dimension_numbers = #tpu.dot_dimension_numbers<[1], [0], [0], [1], [0, 0, 1, 1], [], []>} : vector<128x8xbf16>, vector<8x128xbf16>, vector<128x128xf32> -> vector<128x128xf32>
    %c0_6 = arith.constant 0 : index
    %c0_7 = arith.constant 0 : index
    %c0_8 = arith.constant 0 : index
    %8 = vector.load %arg5[%c0_6, %c0_7, %c0_8] : memref<1x1x128xf32, #tpu.memory_space<vmem>>, vector<1x1x128xf32>
    %cst_9 = arith.constant dense<0xFF800000> : vector<128xf32>
    %9 = vector.multi_reduction <maximumf>, %7, %cst_9 [0] : vector<128x128xf32> to vector<128xf32>
    %10 = vector.shape_cast %9 : vector<128xf32> to vector<1x1x128xf32>
    %11 = arith.maximumf %8, %10 : vector<1x1x128xf32>
    %c0_10 = arith.constant 0 : index
    %c0_11 = arith.constant 0 : index
    %c0_12 = arith.constant 0 : index
    %12 = vector.load %arg5[%c0_10, %c0_11, %c0_12] : memref<1x1x128xf32, #tpu.memory_space<vmem>>, vector<1x1x128xf32>
    tpu.vector_store %arg5[%c0_10, %c0_11, %c0_12], %11 {strides = array<i32>} : memref<1x1x128xf32, #tpu.memory_space<vmem>>, vector<1x1x128xf32>,
    return
  }
  func.func @transform_0(%arg0: i32, %arg1: i32, %arg2: i32) -> (i32, i32, i32) {
    %c0_i32 = arith.constant 0 : i32
    %c0_i32_0 = arith.constant 0 : i32
    return %arg0, %arg2, %c0_i32 : i32, i32, i32
  }
  func.func @transform_1(%arg0: i32, %arg1: i32, %arg2: i32) -> (i32, i32, i32) {
    %c0_i32 = arith.constant 0 : i32
    %c0_i32_0 = arith.constant 0 : i32
    return %arg0, %c0_i32, %arg1 : i32, i32, i32
  }
  func.func @transform_2(%arg0: i32, %arg1: i32, %arg2: i32) -> (i32, i32, i32) {
    %c0_i32 = arith.constant 0 : i32
    %c0_i32_0 = arith.constant 0 : i32
    return %arg0, %c0_i32, %arg1 : i32, i32, i32
  }
}

module attributes {stable_mosaic.version = 11 : i64} {
  func.func @_kl_map_loss_kernel(%arg0: memref<4x128xf32, #tpu.memory_space<vmem>>, %arg1: memref<1x128xf32, #tpu.memory_space<vmem>>, %arg2: memref<4x128xf32, #tpu.memory_space<vmem>>, %arg3: memref<1x1xf32, #tpu.memory_space<smem>>) attributes {dimension_semantics = [], scalar_prefetch = 0 : i64, scratch_operands = 0 : i64, tpu.core_type = #tpu.core_type<tc>} {
    %c0 = arith.constant 0 : index
    %c0_0 = arith.constant 0 : index
    %0 = vector.load %arg0[%c0, %c0_0] : memref<4x128xf32, #tpu.memory_space<vmem>>, vector<4x128xf32>
    %cst = arith.constant dense<0xFF800000> : vector<4xf32>
    %1 = vector.multi_reduction <maximumf>, %0, %cst [1] : vector<4x128xf32> to vector<4xf32>
    %2 = vector.shape_cast %1 : vector<4xf32> to vector<4x1xf32>
    %3 = vector.broadcast %2 : vector<4x1xf32> to vector<4x128xf32>
    %4 = arith.subf %0, %3 : vector<4x128xf32>
    %5 = math.exp %4 : vector<4x128xf32>
    %cst_1 = arith.constant dense<0.000000e+00> : vector<4xf32>
    %6 = vector.multi_reduction <add>, %5, %cst_1 [1] : vector<4x128xf32> to vector<4xf32>
    %7 = vector.shape_cast %6 : vector<4xf32> to vector<4x1xf32>
    %8 = tpu.reciprocal %7 {approx = true} : vector<4x1xf32> -> vector<4x1xf32>
    %9 = vector.broadcast %8 : vector<4x1xf32> to vector<4x128xf32>
    %10 = arith.mulf %5, %9 : vector<4x128xf32>
    %cst_2 = arith.constant dense<0xFF800000> : vector<4xf32>
    %11 = vector.multi_reduction <maximumf>, %10, %cst_2 [1] : vector<4x128xf32> to vector<4xf32>
    %12 = vector.shape_cast %11 : vector<4xf32> to vector<4x1xf32>
    %13 = vector.broadcast %12 : vector<4x1xf32> to vector<4x128xf32>
    %14 = arith.subf %10, %13 : vector<4x128xf32>
    %15 = math.exp %14 : vector<4x128xf32>
    %cst_3 = arith.constant dense<0.000000e+00> : vector<4xf32>
    %16 = vector.multi_reduction <add>, %15, %cst_3 [1] : vector<4x128xf32> to vector<4xf32>
    %17 = vector.shape_cast %16 : vector<4xf32> to vector<4x1xf32>
    %18 = math.log %17 : vector<4x1xf32>
    %19 = vector.broadcast %18 : vector<4x1xf32> to vector<4x128xf32>
    %20 = arith.subf %14, %19 : vector<4x128xf32>
    %c0_4 = arith.constant 0 : index
    %c0_5 = arith.constant 0 : index
    %21 = vector.load %arg2[%c0_4, %c0_5] : memref<4x128xf32, #tpu.memory_space<vmem>>, vector<4x128xf32>
    %cst_6 = arith.constant dense<0xFF800000> : vector<4xf32>
    %22 = vector.multi_reduction <maximumf>, %21, %cst_6 [1] : vector<4x128xf32> to vector<4xf32>
    %23 = vector.shape_cast %22 : vector<4xf32> to vector<4x1xf32>
    %24 = vector.broadcast %23 : vector<4x1xf32> to vector<4x128xf32>
    %25 = arith.subf %21, %24 : vector<4x128xf32>
    %26 = math.exp %25 : vector<4x128xf32>
    %cst_7 = arith.constant dense<0.000000e+00> : vector<4xf32>
    %27 = vector.multi_reduction <add>, %26, %cst_7 [1] : vector<4x128xf32> to vector<4xf32>
    %28 = vector.shape_cast %27 : vector<4xf32> to vector<4x1xf32>
    %29 = tpu.reciprocal %28 {approx = true} : vector<4x1xf32> -> vector<4x1xf32>
    %30 = vector.broadcast %29 : vector<4x1xf32> to vector<4x128xf32>
    %31 = arith.mulf %26, %30 : vector<4x128xf32>
    %c0_8 = arith.constant 0 : index
    %c0_9 = arith.constant 0 : index
    %32 = vector.load %arg1[%c0_8, %c0_9] : memref<1x128xf32, #tpu.memory_space<vmem>>, vector<1x128xf32>
    %33 = vector.broadcast %32 : vector<1x128xf32> to vector<4x128xf32>
    %34 = arith.mulf %33, %31 : vector<4x128xf32>
    %cst_10 = arith.constant dense<0xFF800000> : vector<4xf32>
    %35 = vector.multi_reduction <maximumf>, %34, %cst_10 [1] : vector<4x128xf32> to vector<4xf32>
    %36 = vector.shape_cast %35 : vector<4xf32> to vector<4x1xf32>
    %37 = vector.broadcast %36 : vector<4x1xf32> to vector<4x128xf32>
    %38 = arith.subf %34, %37 : vector<4x128xf32>
    %39 = math.exp %38 : vector<4x128xf32>
    %cst_11 = arith.constant dense<0.000000e+00> : vector<4xf32>
    %40 = vector.multi_reduction <add>, %39, %cst_11 [1] : vector<4x128xf32> to vector<4xf32>
    %41 = vector.shape_cast %40 : vector<4xf32> to vector<4x1xf32>
    %42 = tpu.reciprocal %41 {approx = true} : vector<4x1xf32> -> vector<4x1xf32>
    %43 = vector.broadcast %42 : vector<4x1xf32> to vector<4x128xf32>
    %44 = arith.mulf %39, %43 : vector<4x128xf32>
    %45 = math.log %41 : vector<4x1xf32>
    %46 = vector.broadcast %45 : vector<4x1xf32> to vector<4x128xf32>
    %47 = arith.subf %38, %46 : vector<4x128xf32>
    %48 = arith.subf %47, %20 : vector<4x128xf32>
    %49 = arith.mulf %44, %48 : vector<4x128xf32>
    %50 = vector.shape_cast %49 : vector<4x128xf32> to vector<1x4x128xf32>
    %cst_12 = arith.constant dense<0.000000e+00> : vector<1xf32>
    %51 = vector.multi_reduction <add>, %50, %cst_12 [1, 2] : vector<1x4x128xf32> to vector<1xf32>
    %52 = vector.shape_cast %51 : vector<1xf32> to vector<1x1x1xf32>
    %53 = vector.extract %52[0, 0, 0] : f32 from vector<1x1x1xf32>
    %c0_13 = arith.constant 0 : index
    %c0_14 = arith.constant 0 : index
    %54 = memref.load %arg3[%c0_13, %c0_14] : memref<1x1xf32, #tpu.memory_space<smem>>
    memref.store %53, %arg3[%c0_13, %c0_14] : memref<1x1xf32, #tpu.memory_space<smem>>
    return
  }
}

</mosaic_0001>

<bundles_post_ra>
// kernel: criterion_forward.3
= control target key start
LH: loop header
LB: loop body
LE: loop exit
PB: predicated region body
PF: predicated region fallthrough
CT: control target
= control target key end

     0   :  { %vm16_vm0 = vcmask 1043456   ;;  %s186_s0 = inlined_call_operand.vmem [shape: f32[4,128], index: 0, kind: input, shape index: {}]   ;;  %s187_s1 = inlined_call_operand.vmem [shape: f32[1,128], index: 1, kind: input, shape index: {}]   ;;  %s188_s2 = inlined_call_operand.vmem [shape: f32[4,128], index: 2, kind: input, shape index: {}]   ;;  %s189_s3 = inlined_call_operand.hbm [shape: f32[1,1], index: 3, kind: output, shape index: {}]  }
   0x1   :  { %v40_v0 = vld [vmem:[%s188_s2] sm:$0xf] }
   0x2   :  { %v15_v1 = vld [vmem:[%s186_s0] sm:$0xf]  ;;  %v41_v2 = vsel %vm16_vm0, %v40_v0, -inf }
   0x3   :  { %8 = vsyncpa [#allocation3], 0  ;;  %42 = vmax.xlane.f32.xlu0 %v41_v2  ;;  %v17_v3 = vsel %vm16_vm0, %v15_v1, -inf  ;;  %v101_v17 = vld [vmem:[%s187_s1] ss:$0 sm:$0xff]  ;;  %s123_s18 = scalar_lea.hbm %s189_s3, 16 }
   0x4   :  { %p124_p0 = scmp.ne.s32.totalorder %s189_s3, %s123_s18  ;;  %p127_p1 = scmp.lt.u32.totalorder %s123_s18, %s189_s3 }
   0x6   :  { %p129_p2 = pnand %p127_p1, %p124_p0 }
   0x7   :  { %18 = vmax.xlane.f32.xlu0 %v17_v3 }
  0x90   :  { %v43_v4 = vpop.xlane.xlu0 %42 }
  0x91   :  { %v44_v5 = vsub.f32 %v40_v0, %v43_v4 }
  0x93   :  { %v45_v6 = vmul.f32 1.442695, %v44_v5 }
  0x94   :  { %v19_v7 = vpop.xlane.xlu0 %18 }
  0x95   :  { %105 = vpow2.f32 %v45_v6  ;;  %v20_v8 = vsub.f32 %v15_v1, %v19_v7 }
  0x97   :  { %v21_v9 = vmul.f32 1.442695, %v20_v8 }
  0x99   :  { %107 = vpow2.f32 %v21_v9 }
  0x9f   :  { %v106_v10 = vpop.eup %105 }
  0xa0   :  { %v47_v11 = vsel %vm16_vm0, %v106_v10, 0.0 }
  0xa1   :  { %48 = vadd.xlane.f32.xlu1 %v47_v11 }
  0xa3   :  { %v108_v12 = vpop.eup %107 }
  0xa4   :  { %v23_v13 = vsel %vm16_vm0, %v108_v12, 0.0 }
  0xa5   :  { %24 = vadd.xlane.f32.xlu1 %v23_v13 }
 0x12e   :  { %v49_v14 = vpop.xlane.xlu1 %48 }
 0x12f   :  { %109 = vrcp.f32 %v49_v14 }
 0x132   :  { %v25_v15 = vpop.xlane.xlu1 %24 }
 0x133   :  { %111 = vrcp.f32 %v25_v15 }
 0x139   :  { %v110_v16 = vpop.eup %109 }
 0x13a   :  { %v51_v18 = vmul.f32 %v110_v16, %v106_v10 }
 0x13c   :  { %v59_v19 = vmul.f32 %v101_v17, %v51_v18 }
 0x13d   :  { %v112_v20 = vpop.eup %111 }
 0x13e   :  { %v60_v21 = vsel %vm16_vm0, %v59_v19, -inf  ;;  %v27_v22 = vmul.f32 %v112_v20, %v108_v12 }
 0x13f   :  { %61 = vmax.xlane.f32.xlu1 %v60_v21 }
 0x140   :  { %v28_v23 = vsel %vm16_vm0, %v27_v22, -inf }
 0x141   :  { %29 = vmax.xlane.f32.xlu0 %v28_v23 }
 0x1cc   :  { %v62_v24 = vpop.xlane.xlu1 %61 }
 0x1cd   :  { %v63_v25 = vsub.f32 %v59_v19, %v62_v24 }
 0x1ce   :  { %v30_v26 = vpop.xlane.xlu0 %29 }
 0x1cf   :  { %v64_v27 = vmul.f32 1.442695, %v63_v25  ;;  %v31_v28 = vsub.f32 %v27_v22, %v30_v26 }
 0x1d1   :  { %113 = vpow2.f32 %v64_v27  ;;  %v32_v29 = vmul.f32 1.442695, %v31_v28 }
 0x1d3   :  { %115 = vpow2.f32 %v32_v29 }
 0x1db   :  { %v114_v30 = vpop.eup %113 }
 0x1dc   :  { %v66_v31 = vsel %vm16_vm0, %v114_v30, 0.0 }
 0x1dd   :  { %v116_v32 = vpop.eup %115  ;;  %67 = vadd.xlane.f32.xlu1 %v66_v31 }
 0x1de   :  { %v34_v33 = vsel %vm16_vm0, %v116_v32, 0.0 }
 0x1df   :  { %35 = vadd.xlane.f32.xlu0 %v34_v33 }
 0x26a   :  { %v68_v34 = vpop.xlane.xlu1 %67 }
 0x26b   :  { %117 = vlog2.f32 %v68_v34 }
 0x26c   :  { %v36_v35 = vpop.xlane.xlu0 %35 }
 0x26d   :  { %119 = vlog2.f32 %v36_v35 }
 0x26e   :  { %121 = vrcp.f32 %v68_v34 }
 0x275   :  { %v118_v36 = vpop.eup %117 }
 0x276   :  { %v72_v38 = vmul.f32 0.6931472, %v118_v36 }
 0x277   :  { %v120_v37 = vpop.eup %119 }
 0x278   :  { %v38_v39 = vmul.f32 0.6931472, %v120_v37  ;;  %v122_v40 = vpop.eup %121  ;;  %v73_v41 = vsub.f32 %v63_v25, %v72_v38 }
 0x279   :  { %v70_v43 = vmul.f32 %v122_v40, %v114_v30 }
 0x27a   :  { %v39_v42 = vsub.f32 %v31_v28, %v38_v39 }
 0x27c   :  { %v74_v44 = vsub.f32 %v73_v41, %v39_v42 }
 0x27e   :  { %v75_v45 = vmul.f32 %v74_v44, %v70_v43 }
 0x280   :  { %v76_v46 = vsel %vm16_vm0, %v75_v45, 0.0 }
 0x281   :  { %77 = vadd.xlane.f32.xlu0 %v76_v46 }
 0x30e   :  { %v78_v47 = vpop.xlane.xlu0 %77 }
 0x30f   :  { %v79_v48 = vrot.slane %v78_v47, 4 }
 0x311   :  { %v80_v49 = vadd.f32 %v79_v48, %v78_v47 }
 0x313   :  { %v81_v50 = vrot.slane %v80_v49, 2 }
 0x315   :  { %v82_v51 = vadd.f32 %v81_v50, %v80_v49 }
 0x317   :  { %v83_v52 = vrot.slane %v82_v51, 1 }
 0x319   :  { %v84_v53 = vadd.f32 %v83_v52, %v82_v51 }
 0x31b   :  { %102 = vpush %v84_v53 }
 0x34c   :  { %s103_s1 = spop %102 }
 0x34d   :  { %87 = sst [smem:[#allocation2]] %s103_s1 }
 0x34e   :  { %132 = shalt.err (!%p129_p2)
}
 0x34f   :  { %s135_s23 = smov [#allocation2]  }
 0x350   :  { %95 = dma.smem_to_hbm %s135_s23, 16, %s189_s3, [#allocation3]  }
 0x351   :  { %133 = dma.done.wait [#allocation3], 16  }
 0x352   :  { %134 = vsyncadd [#allocation3], 4294967280 }
 0x353   :  { %99 = sfence }
 0x354   :  { %100 = vsyncpa [#allocation3], 1 }

// kernel: criterion_forward.2
= control target key start
LH: loop header
LB: loop body
LE: loop exit
PB: predicated region body
PF: predicated region fallthrough
CT: control target
= control target key end

     0   :  { %s644_s9 = smov 0   ;;  %s646_s10 = smov 0   ;;  %s693_s0 = inlined_call_operand.vmem [shape: bf16[4,128,8], index: 0, kind: input, shape index: {}]   ;;  %s694_s1 = inlined_call_operand.vmem [shape: bf16[4,8,128], index: 1, kind: input, shape index: {}]   ;;  %s695_s2 = inlined_call_operand.vmem [shape: f32[4,1,128], index: 2, kind: output, shape index: {}]  }
   0x1   :  { %s648_s11 = smov 0  }
   0x2 LB: > { %s31_s12 = sadd.s32 1, %s622_s10  ;;  %p517_p0 = scmp.ge.s32.totalorder %s626_s11, 1  ;;  %s626_s11 = sphi %s648_s11, %s12_s11   ;;  %s622_s10 = sphi %s646_s10, %s697_s10   ;;  %s618_s9 = sphi %s644_s9, %s696_s9  }
   0x3   : > { %p33_p1 = scmp.ge.s32.totalorder %s31_s12, 4  ;;  %p154_p2 = scmp.lt.s32.totalorder %s626_s11, 5 }
   0x5   : > { %s699_s12 = smov (%p33_p1, %s31_s12), 0  ;;  %p155_p3 = pnand %p517_p0, %p154_p2 }
   0x6   : > { %p189_p4 = scmp.lt.s32.totalorder (!%p155_p3), %s618_s9, 3  ;;  %vm299_vm0 = vcmask (!%p155_p3), 1043456   ;;  %vm274_vm1 = vcmask (!%p155_p3), 64512   ;;  %v628_v1 = vmov (!%p155_p3), -inf  }
   0x7   : > { %158 = sbr.rel (%p155_p3) target bundleno = 270 (0x10e), region = 28 }
   0xe   : > { %s701_s9 = smov (!%p189_p4, %s618_s9), 3 }
   0xf   : > { %s539_s13 = sshll.u32 %s701_s9, 6  ;;  %s520_s14 = sshll.u32 %s701_s9, 2 }
  0x10   : > { %s196_s17 = scalar_lea.vmem %s693_s0, %s539_s13  ;;  %s204_s20 = scalar_lea.vmem %s694_s1, %s520_s14 }
  0x11   : > { %s671_s23 = scalar_lea.vmem %s695_s2, %s701_s9  ;;  %v233_v0 = vld [vmem:[%s204_s20] sm:$0xf]  ;;  %v597_v4 = vld [vmem:[%s196_s17 + $0x8] sm:$0xff]   ;;  %v600_v7 = vld [vmem:[%s196_s17 + $0x10] sm:$0xff]  }
  0x12   : > { %216 = vst [vmem:[%s671_s23] sm:$0x1] %v628_v1  ;;  %569 = vmatprep.subr.msk.bf16.mxu0 %vm299_vm0, %v233_v0  ;;  %570 = vmatprep.subr.msk.bf16.mxu1 %vm299_vm0, %v233_v0  ;;  %v301_v2 = vsel %vm299_vm0, %v233_v0, 0  ;;  %v596_v3 = vld [vmem:[%s196_s17] sm:$0xff]   ;;  %v599_v6 = vld [vmem:[%s196_s17 + $0x28] sm:$0xff]   ;;  %v602_v8 = vld [vmem:[%s196_s17 + $0x30] sm:$0xff]  }
  0x13   : > { %550 = vmatpush3.bf16.msra.mxu0 %v301_v2  ;;  %568 = vmatpush3.bf16.msra.mxu1 %v301_v2  ;;  %v598_v5 = vld [vmem:[%s196_s17 + $0x20] sm:$0xff]   ;;  %v601_v9 = vld [vmem:[%s196_s17 + $0x18] sm:$0xff]  }
  0x14   : > { %551 = vmatprep.mubr.msk.bf16.mxu0 %vm274_vm1, %v596_v3  ;;  %559 = vmatprep.mubr.msk.bf16.mxu1 %vm274_vm1, %v598_v5  ;;  %v603_v10 = vld [vmem:[%s196_s17 + $0x38] sm:$0xff]  }
  0x16   : > { %552 = vmatmul.mubr.msk.bf16.vlgmr.msra.gmra.mrb[0].mxu0 %vm274_vm1, %v597_v4  ;;  %560 = vmatmul.mubr.msk.bf16.vlgmr.msra.gmra.mrb[0].mxu1 %vm274_vm1, %v599_v6 }
  0x17   : > { %555 = vmatprep.mubr.msk.bf16.mxu0 %vm274_vm1, %v600_v7  ;;  %563 = vmatprep.mubr.msk.bf16.mxu1 %vm274_vm1, %v602_v8 }
  0x19   : > { %v400_v47 = vld [vmem:[%s671_s23] sm:$0x1] }
  0x1e   : > { %556 = vmatmul.mubr.msk.bf16.gmra.mrb[4].mxu0 %vm274_vm1, %v601_v9  ;;  %564 = vmatmul.mubr.msk.bf16.gmra.mrb[4].mxu1 %vm274_vm1, %v603_v10 }
  0xe9   : > { %v553_v11 = vpop.f32.mrb[0].mxu0  ;;  %v561_v13 = vpop.f32.mrb[0].mxu1 }
  0xea   : > { %v337_v12 = vpop.f32.mrb[1].mxu0  ;;  %v369_v15 = vpop.f32.mrb[1].mxu1 }
  0xeb   : > { %v554_v14 = vpop.f32.mrb[2].mxu0  ;;  %v562_v17 = vpop.f32.mrb[2].mxu1 }
  0xec   : > { %v340_v16 = vpop.f32.mrb[3].mxu0  ;;  %v372_v18 = vpop.f32.mrb[3].mxu1 }
  0xf1   : > { %v557_v19 = vpop.f32.mrb[4].mxu0  ;;  %v565_v22 = vpop.f32.mrb[4].mxu1 }
  0xf2   : > { %v403_v20 = vmax.f32 %v553_v11, %v557_v19  ;;  %v353_v21 = vpop.f32.mrb[5].mxu0  ;;  %v385_v25 = vpop.f32.mrb[5].mxu1 }
  0xf3   : > { %v401_v23 = vmax.f32 %v337_v12, %v353_v21  ;;  %v558_v24 = vpop.f32.mrb[6].mxu0  ;;  %v566_v29 = vpop.f32.mrb[6].mxu1 }
  0xf4   : > { %v407_v26 = vmax.f32 %v403_v20, %v561_v13  ;;  %v404_v27 = vmax.f32 %v554_v14, %v558_v24  ;;  %v356_v28 = vpop.f32.mrb[7].mxu0  ;;  %v388_v32 = vpop.f32.mrb[7].mxu1 }
  0xf5   : > { %v405_v30 = vmax.f32 %v401_v23, %v369_v15  ;;  %v402_v31 = vmax.f32 %v340_v16, %v356_v28 }
  0xf6   : > { %v411_v33 = vmax.f32 %v407_v26, %v565_v22  ;;  %v408_v34 = vmax.f32 %v404_v27, %v562_v17 }
  0xf7   : > { %v409_v35 = vmax.f32 %v405_v30, %v385_v25  ;;  %v406_v36 = vmax.f32 %v402_v31, %v372_v18 }
  0xf8   : > { %v412_v37 = vmax.f32 %v408_v34, %v566_v29 }
  0xf9   : > { %v410_v38 = vmax.f32 %v406_v36, %v388_v32 }
  0xfa   : > { %v414_v39 = vmax.f32 %v411_v33, %v412_v37 }
  0xfb   : > { %v413_v40 = vmax.f32 %v409_v35, %v410_v38 }
  0xfd   : > { %v415_v41 = vmax.f32 %v413_v40, %v414_v39 }
  0xff   : > { %v416_v42 = vrot.slane %v415_v41, 4 }
 0x101   : > { %v417_v43 = vmax.f32 %v415_v41, %v416_v42 }
 0x103   : > { %v418_v44 = vrot.slane %v417_v43, 2 }
 0x105   : > { %v419_v45 = vmax.f32 %v417_v43, %v418_v44 }
 0x107   : > { %v420_v46 = vrot.slane %v419_v45, 1 }
 0x109   : > { %v421_v48 = vmax.f32 %v419_v45, %v420_v46 }
 0x10b   : > { %v422_v49 = vmax.f32 %v400_v47, %v421_v48 }
 0x10d   : > { %423 = vst [vmem:[%s671_s23] sm:$0x1] %v422_v49 }
 0x10e PF: > { %s12_s11 = sadd.s32 1, %s626_s11   ;;  %s696_s9 = smov %s622_s10 }
 0x10f   : > { %p9_p5 = scmp.ge.s32.totalorder %s12_s11, 6   ;;  %s697_s10 = smov %s699_s12 }
 0x111   :  { %11 = sbr.rel (!%p9_p5) target bundleno = 2 (0x2), region = 65 }

</bundles_post_ra>
